<compile_context>
chip_gen: v7x
topology: tpu7x:2x2x1
jax: 0.10.0
libtpu: 0.0.40
codegen_flags: <defaults>
</compile_context>

<pallas_src>
import functools

import jax
import jax.numpy as jnp
from jax.experimental import pallas as pl
from jax.experimental.pallas import tpu as pltpu

LANES = 128


def _round_up(a, b):
    return (a + b - 1) // b * b


def _combined_loss_kernel(x_ref, y_ref, out_ref, *, tile_r, rows_valid,
                          tiles_per_shard, maybe_partial):
    """x_ref/y_ref: (tile_r, 128) probability/mask tiles.
    out_ref: (1, 3, 8, 128) f32 running accumulators (inter, overlap, bce_sum)."""
    s = pl.program_id(0)   # shard ("parallel") axis
    i = pl.program_id(1)   # streaming ("arbitrary") axis

    @pl.when(i == 0)
    def _():
        out_ref[...] = jnp.zeros_like(out_ref)

    def accumulate(mask_tail):
        x = x_ref[...].astype(jnp.float32)
        y = y_ref[...].astype(jnp.float32)

        # sigmoid(x) == 0.5*tanh(0.5*x) + 0.5 : single EUP push, no divide/select.
        sig = 0.5 * jnp.tanh(0.5 * x) + 0.5

        inter = sig * y
        overlap = sig + y

        # nn.BCELoss element terms (outputs are probabilities; logs clamped at
        # -100 like torch).  Two logs kept so soft masks keep exact semantics.
        logx = jnp.maximum(jnp.log(x), -100.0)
        log1mx = jnp.maximum(jnp.log1p(-x), -100.0)
        bce = -(y * logx + (1.0 - y) * log1mx)

        if mask_tail:
            # jnp.where (not multiply) so garbage rows past the end of the array
            # cannot inject NaN/Inf into the accumulators.
            row0 = (s * tiles_per_shard + i) * tile_r
            rows = row0 + jax.lax.broadcasted_iota(jnp.int32, (tile_r, LANES), 0)
            valid = rows < rows_valid
            inter = jnp.where(valid, inter, 0.0)
            overlap = jnp.where(valid, overlap, 0.0)
            bce = jnp.where(valid, bce, 0.0)

        # Fold the tile into a vreg-shaped (8, 128) partial with pure VPU adds;
        # the expensive cross-lane reduction happens once, in the wrapper.
        def fold(v):
            return v.reshape(tile_r // 8, 8, LANES).sum(axis=0)

        out_ref[0, 0] = out_ref[0, 0] + fold(inter)
        out_ref[0, 1] = out_ref[0, 1] + fold(overlap)
        out_ref[0, 2] = out_ref[0, 2] + fold(bce)

    if maybe_partial:
        # Only the last (possibly partial / index-clamped) grid steps take the
        # masked branch; every full tile runs the cheap unmasked path.
        row_end = (s * tiles_per_shard + i + 1) * tile_r
        is_full = row_end <= rows_valid

        @pl.when(is_full)
        def _():
            accumulate(False)

        @pl.when(jnp.logical_not(is_full))
        def _():
            accumulate(True)
    else:
        accumulate(False)


def _combined_loss_jax(outputs, masks, smooth=1.0, alpha=0.5):
    """Fused pure-JAX path mirroring the PyTorch CombinedLoss module."""
    x = outputs.astype(jnp.float32)
    y = masks.astype(jnp.float32)
    sig = jax.nn.sigmoid(x)
    inter = jnp.sum(sig * y)
    union = jnp.sum(sig + y) - inter
    iou = (inter + smooth) / (union + smooth)
    logx = jnp.maximum(jnp.log(x), -100.0)
    log1mx = jnp.maximum(jnp.log1p(-x), -100.0)
    bce = jnp.mean(-(y * logx + (1.0 - y) * log1mx))
    return alpha * (1.0 - iou) + (1.0 - alpha) * bce


_reference = _combined_loss_jax


def combined_loss(outputs, masks, smooth=1.0, alpha=0.5, *, tile_rows=2048,
                  num_shards=2, min_kernel_elements=1 << 20):
    """outputs: probabilities in [0,1], shape (B, 1, H, W); masks: same shape.
    Returns scalar f32 loss = alpha*(1 - iou) + (1-alpha)*BCE."""
    assert outputs.shape == masks.shape
    n = outputs.size

    # Small inputs: launch + partial-reduce overhead dominates; XLA's fused
    # elementwise+reduce is already near roofline.  Lane-misaligned inputs
    # (n % 128 != 0) would force a full padded HBM copy which costs more than
    # the kernel saves, so they also take the pure-JAX path.
    if n == 0 or n < min_kernel_elements or n % LANES != 0:
        return _combined_loss_jax(outputs, masks, smooth, alpha)

    R = n // LANES
    tile_rows = _round_up(max(tile_rows, 8), 8)
    tile_r = max(8, min(tile_rows, _round_up(pl.cdiv(R, num_shards), 8)))
    total_tiles = pl.cdiv(R, tile_r)
    num_shards_eff = max(1, min(num_shards, total_tiles))
    tiles_per_shard = pl.cdiv(total_tiles, num_shards_eff)
    needs_clamp = num_shards_eff * tiles_per_shard > total_tiles
    maybe_partial = (R % tile_r != 0) or needs_clamp

    # Zero-copy: reshape the contiguous NCHW tensor to a lane-dense slab and
    # keep the native dtype (bf16 inputs halve HBM traffic); cast in-kernel.
    x2 = outputs.reshape(R, LANES)
    y2 = masks.reshape(R, LANES)

    if needs_clamp:
        # Grid steps past the last real tile re-read the final block (tiny,
        # < num_shards wasted DMAs) and contribute zero via the masked branch.
        in_map = lambda s, i: (jnp.minimum(s * tiles_per_shard + i,
                                           total_tiles - 1), 0)
    else:
        in_map = lambda s, i: (s * tiles_per_shard + i, 0)

    kernel = functools.partial(
        _combined_loss_kernel,
        tile_r=tile_r,
        rows_valid=R,
        tiles_per_shard=tiles_per_shard,
        maybe_partial=maybe_partial,
    )

    partials = pl.pallas_call(
        kernel,
        out_shape=jax.ShapeDtypeStruct((num_shards_eff, 3, 8, LANES),
                                       jnp.float32),
        grid_spec=pltpu.PrefetchScalarGridSpec(
            num_scalar_prefetch=0,
            grid=(num_shards_eff, tiles_per_shard),
            in_specs=[
                pl.BlockSpec((tile_r, LANES), in_map),
                pl.BlockSpec((tile_r, LANES), in_map),
            ],
            out_specs=pl.BlockSpec((1, 3, 8, LANES), lambda s, i: (s, 0, 0, 0)),
        ),
        compiler_params=pltpu.CompilerParams(
            dimension_semantics=("parallel", "arbitrary"),
            vmem_limit_bytes=32 * 1024 * 1024,
        ),
    )(x2, y2)

    # One cross-lane reduction + final scalar math, outside the kernel.
    sums = jnp.sum(partials, axis=(0, 2, 3))          # (3,)
    inter, overlap, bce_sum = sums[0], sums[1], sums[2]
    union = overlap - inter
    iou = (inter + smooth) / (union + smooth)
    bce = bce_sum / n
    return alpha * (1.0 - iou) + (1.0 - alpha) * bce


if __name__ == "__main__":
    key = jax.random.PRNGKey(0)

    # Small NCHW single-channel segmentation shapes.  Each case forces the
    # Pallas path (min_kernel_elements=0) and is checked against the pure-JAX
    # reference: exact tiling, a partial final tile, and an uneven shard split.
    cases = [
        ((2, 1, 32, 32), {}),                 # tiles divide evenly
        ((2, 1, 24, 24), {}),                 # partial final tile (masked path)
        ((2, 1, 40, 64), {"tile_rows": 8}),   # clamped block index on last shard
    ]
    for idx, (shape, kw) in enumerate(cases):
        ka, kb = jax.random.split(jax.random.fold_in(key, idx))
        # nn.BCELoss expects probabilities -> feed sigmoid-squashed values.
        outputs = jax.nn.sigmoid(jax.random.normal(ka, shape, dtype=jnp.float32))
        masks = jax.random.bernoulli(kb, 0.3, shape).astype(jnp.float32)

        loss = jax.block_until_ready(
            combined_loss(outputs, masks, smooth=1.0, alpha=0.5,
                          min_kernel_elements=0, **kw))
        ref = jax.block_until_ready(_reference(outputs, masks, 1.0, 0.5))
        assert jnp.allclose(loss, ref, rtol=1e-5, atol=1e-5), (shape, loss, ref)

    print("KERNEL_OK")
</pallas_src>

<mosaic_0001>
module attributes {stable_mosaic.version = 11 : i64} {
  func.func @_combined_loss_kernel(%arg0: i32, %arg1: i32, %arg2: memref<8x128xf32, #tpu.memory_space<vmem>>, %arg3: memref<8x128xf32, #tpu.memory_space<vmem>>, %arg4: memref<1x3x8x128xf32, #tpu.memory_space<vmem>>) attributes {dimension_semantics = [#tpu.dimension_semantics<parallel>, #tpu.dimension_semantics<arbitrary>], iteration_bounds = array<i64: 2, 1>, scalar_prefetch = 0 : i64, scratch_operands = 0 : i64, tpu.core_type = #tpu.core_type<tc>, window_params = [{transform_indices = @transform_0, window_bounds = array<i64: 8, 128>}, {transform_indices = @transform_1, window_bounds = array<i64: 8, 128>}, {transform_indices = @transform_2, window_bounds = array<i64: 1, 3, 8, 128>}]} {
    %c0_i32 = arith.constant 0 : i32
    %0 = arith.cmpi eq, %arg1, %c0_i32 : i32
    %1 = arith.extui %0 : i1 to i32
    %c0_i32_0 = arith.constant 0 : i32
    %2 = arith.cmpi ne, %1, %c0_i32_0 : i32
    scf.if %2 {
      %cst_36 = arith.constant 0.000000e+00 : f32
      %53 = vector.broadcast %cst_36 : f32 to vector<1x3x8x128xf32>
      %c0_37 = arith.constant 0 : index
      %c0_38 = arith.constant 0 : index
      %c0_39 = arith.constant 0 : index
      %c0_40 = arith.constant 0 : index
      %54 = vector.load %arg4[%c0_37, %c0_38, %c0_39, %c0_40] : memref<1x3x8x128xf32, #tpu.memory_space<vmem>>, vector<1x3x8x128xf32>
      tpu.vector_store %arg4[%c0_37, %c0_38, %c0_39, %c0_40], %53 {strides = array<i32>} : memref<1x3x8x128xf32, #tpu.memory_space<vmem>>, vector<1x3x8x128xf32>,
    } else {
    }
    %c0 = arith.constant 0 : index
    %c0_1 = arith.constant 0 : index
    %3 = vector.load %arg2[%c0, %c0_1] : memref<8x128xf32, #tpu.memory_space<vmem>>, vector<8x128xf32>
    %c0_2 = arith.constant 0 : index
    %c0_3 = arith.constant 0 : index
    %4 = vector.load %arg3[%c0_2, %c0_3] : memref<8x128xf32, #tpu.memory_space<vmem>>, vector<8x128xf32>
    %cst = arith.constant 5.000000e-01 : f32
    %5 = vector.broadcast %cst : f32 to vector<8x128xf32>
    %6 = arith.mulf %5, %3 : vector<8x128xf32>
    %7 = math.tanh %6 : vector<8x128xf32>
    %cst_4 = arith.constant 5.000000e-01 : f32
    %8 = vector.broadcast %cst_4 : f32 to vector<8x128xf32>
    %9 = arith.mulf %8, %7 : vector<8x128xf32>
    %cst_5 = arith.constant 5.000000e-01 : f32
    %10 = vector.broadcast %cst_5 : f32 to vector<8x128xf32>
    %11 = arith.addf %9, %10 : vector<8x128xf32>
    %12 = arith.mulf %11, %4 : vector<8x128xf32>
    %13 = arith.addf %11, %4 : vector<8x128xf32>
    %14 = math.log %3 : vector<8x128xf32>
    %cst_6 = arith.constant -1.000000e+02 : f32
    %15 = vector.broadcast %cst_6 : f32 to vector<8x128xf32>
    %16 = arith.maximumf %14, %15 : vector<8x128xf32>
    %cst_7 = arith.constant 0.000000e+00 : f32
    %17 = vector.broadcast %cst_7 : f32 to vector<8x128xf32>
    %18 = arith.subf %17, %3 : vector<8x128xf32>
    %19 = math.log1p %18 : vector<8x128xf32>
    %cst_8 = arith.constant -1.000000e+02 : f32
    %20 = vector.broadcast %cst_8 : f32 to vector<8x128xf32>
    %21 = arith.maximumf %19, %20 : vector<8x128xf32>
    %22 = arith.mulf %4, %16 : vector<8x128xf32>
    %cst_9 = arith.constant 1.000000e+00 : f32
    %23 = vector.broadcast %cst_9 : f32 to vector<8x128xf32>
    %24 = arith.subf %23, %4 : vector<8x128xf32>
    %25 = arith.mulf %24, %21 : vector<8x128xf32>
    %26 = arith.addf %22, %25 : vector<8x128xf32>
    %cst_10 = arith.constant 0.000000e+00 : f32
    %27 = vector.broadcast %cst_10 : f32 to vector<8x128xf32>
    %28 = arith.subf %27, %26 : vector<8x128xf32>
    %c0_11 = arith.constant 0 : index
    %c0_12 = arith.constant 0 : index
    %c0_13 = arith.constant 0 : index
    %c0_14 = arith.constant 0 : index
    %29 = vector.load %arg4[%c0_11, %c0_12, %c0_13, %c0_14] : memref<1x3x8x128xf32, #tpu.memory_space<vmem>>, vector<1x1x8x128xf32>
    %30 = vector.shape_cast %29 : vector<1x1x8x128xf32> to vector<8x128xf32>
    %31 = vector.shape_cast %12 : vector<8x128xf32> to vector<1x8x128xf32>
    %cst_15 = arith.constant dense<0.000000e+00> : vector<8x128xf32>
    %32 = vector.multi_reduction <add>, %31, %cst_15 [0] : vector<1x8x128xf32> to vector<8x128xf32>
    %33 = arith.addf %30, %32 : vector<8x128xf32>
    %c0_16 = arith.constant 0 : index
    %c0_17 = arith.constant 0 : index
    %c0_18 = arith.constant 0 : index
    %c0_19 = arith.constant 0 : index
    %34 = vector.load %arg4[%c0_16, %c0_17, %c0_18, %c0_19] : memref<1x3x8x128xf32, #tpu.memory_space<vmem>>, vector<1x1x8x128xf32>
    %35 = vector.shape_cast %34 : vector<1x1x8x128xf32> to vector<8x128xf32>
    %36 = vector.shape_cast %33 : vector<8x128xf32> to vector<1x1x8x128xf32>
    tpu.vector_store %arg4[%c0_16, %c0_17, %c0_18, %c0_19], %36 {strides = array<i32>} : memref<1x3x8x128xf32, #tpu.memory_space<vmem>>, vector<1x1x8x128xf32>,
    %c0_20 = arith.constant 0 : index
    %c1 = arith.constant 1 : index
    %c0_21 = arith.constant 0 : index
    %c0_22 = arith.constant 0 : index
    %37 = vector.load %arg4[%c0_20, %c1, %c0_21, %c0_22] : memref<1x3x8x128xf32, #tpu.memory_space<vmem>>, vector<1x1x8x128xf32>
    %38 = vector.shape_cast %37 : vector<1x1x8x128xf32> to vector<8x128xf32>
    %39 = vector.shape_cast %13 : vector<8x128xf32> to vector<1x8x128xf32>
    %cst_23 = arith.constant dense<0.000000e+00> : vector<8x128xf32>
    %40 = vector.multi_reduction <add>, %39, %cst_23 [0] : vector<1x8x128xf32> to vector<8x128xf32>
    %41 = arith.addf %38, %40 : vector<8x128xf32>
    %c0_24 = arith.constant 0 : index
    %c1_25 = arith.constant 1 : index
    %c0_26 = arith.constant 0 : index
    %c0_27 = arith.constant 0 : index
    %42 = vector.load %arg4[%c0_24, %c1_25, %c0_26, %c0_27] : memref<1x3x8x128xf32, #tpu.memory_space<vmem>>, vector<1x1x8x128xf32>
    %43 = vector.shape_cast %42 : vector<1x1x8x128xf32> to vector<8x128xf32>
    %44 = vector.shape_cast %41 : vector<8x128xf32> to vector<1x1x8x128xf32>
    tpu.vector_store %arg4[%c0_24, %c1_25, %c0_26, %c0_27], %44 {strides = array<i32>} : memref<1x3x8x128xf32, #tpu.memory_space<vmem>>, vector<1x1x8x128xf32>,
    %c0_28 = arith.constant 0 : index
    %c2 = arith.constant 2 : index
    %c0_29 = arith.constant 0 : index
    %c0_30 = arith.constant 0 : index
    %45 = vector.load %arg4[%c0_28, %c2, %c0_29, %c0_30] : memref<1x3x8x128xf32, #tpu.memory_space<vmem>>, vector<1x1x8x128xf32>
    %46 = vector.shape_cast %45 : vector<1x1x8x128xf32> to vector<8x128xf32>
    %47 = vector.shape_cast %28 : vector<8x128xf32> to vector<1x8x128xf32>
    %cst_31 = arith.constant dense<0.000000e+00> : vector<8x128xf32>
    %48 = vector.multi_reduction <add>, %47, %cst_31 [0] : vector<1x8x128xf32> to vector<8x128xf32>
    %49 = arith.addf %46, %48 : vector<8x128xf32>
    %c0_32 = arith.constant 0 : index
    %c2_33 = arith.constant 2 : index
    %c0_34 = arith.constant 0 : index
    %c0_35 = arith.constant 0 : index
    %50 = vector.load %arg4[%c0_32, %c2_33, %c0_34, %c0_35] : memref<1x3x8x128xf32, #tpu.memory_space<vmem>>, vector<1x1x8x128xf32>
    %51 = vector.shape_cast %50 : vector<1x1x8x128xf32> to vector<8x128xf32>
    %52 = vector.shape_cast %49 : vector<8x128xf32> to vector<1x1x8x128xf32>
    tpu.vector_store %arg4[%c0_32, %c2_33, %c0_34, %c0_35], %52 {strides = array<i32>} : memref<1x3x8x128xf32, #tpu.memory_space<vmem>>, vector<1x1x8x128xf32>,
    return
  }
  func.func @transform_0(%arg0: i32, %arg1: i32) -> (i32, i32) {
    %c1_i32 = arith.constant 1 : i32
    %0 = arith.muli %arg0, %c1_i32 : i32
    %1 = arith.addi %0, %arg1 : i32
    %c0_i32 = arith.constant 0 : i32
    %c0_i32_0 = arith.constant 0 : i32
    return %1, %c0_i32 : i32, i32
  }
  func.func @transform_1(%arg0: i32, %arg1: i32) -> (i32, i32) {
    %c1_i32 = arith.constant 1 : i32
    %0 = arith.muli %arg0, %c1_i32 : i32
    %1 = arith.addi %0, %arg1 : i32
    %c0_i32 = arith.constant 0 : i32
    %c0_i32_0 = arith.constant 0 : i32
    return %1, %c0_i32 : i32, i32
  }
  func.func @transform_2(%arg0: i32, %arg1: i32) -> (i32, i32, i32, i32) {
    %c0_i32 = arith.constant 0 : i32
    %c0_i32_0 = arith.constant 0 : i32
    %c0_i32_1 = arith.constant 0 : i32
    %c0_i32_2 = arith.constant 0 : i32
    return %arg0, %c0_i32, %c0_i32_0, %c0_i32_1 : i32, i32, i32, i32
  }
}

</mosaic_0001>

<bundles_post_ra>
// kernel: tpu_custom_call.1
= control target key start
LH: loop header
LB: loop body
LE: loop exit
PB: predicated region body
PF: predicated region fallthrough
CT: control target
= control target key end

     0   :  { %7 = vsyncpa [#allocation3], 0  ;;  %s871_s0 = inlined_call_operand.hbm [shape: f32[16,128], index: 0, kind: input, shape index: {}]   ;;  %s872_s1 = inlined_call_operand.hbm [shape: f32[16,128], index: 1, kind: input, shape index: {}]   ;;  %s873_s2 = inlined_call_operand.hbm [shape: f32[2,3,8,128], index: 2, kind: output, shape index: {}]  }
   0x1   :  { %9 = vsyncpa [#allocation3 + $0x1], 0 }
   0x2   :  { %10 = vsyncpa [#allocation6], 0 }
   0x3   :  { %12 = vsyncpa [#allocation6 + $0x1], 0 }
   0x4   :  { %13 = vsyncpa [#allocation4], 0 }
   0x5   :  { %15 = vsyncpa [#allocation4 + $0x1], 0  ;;  %s648_s9 = smov 0   ;;  %s650_s10 = smov 0  }
   0x6   :  { %s652_s11 = smov 0   ;;  %s654_s12 = smov 0  }
   0x7   :  { %s656_s13 = smov 0   ;;  %s658_s14 = smov 0  }
   0x8 LB: > { %s384_s15 = sadd.s32 4294967295, %s626_s14   ;;  %s385_s16 = sadd.s32 4294967294, %s626_s14   ;;  %s626_s14 = sphi %s658_s14, %s21_s14   ;;  %s622_s13 = sphi %s656_s13, %s893_s13   ;;  %s618_s12 = sphi %s654_s12, %s892_s12   ;;  %s614_s11 = sphi %s652_s11, %s891_s11   ;;  %s610_s10 = sphi %s650_s10, %s890_s10   ;;  %s606_s9 = sphi %s648_s9, %s889_s9  }
   0x9   : > { %s33_s17 = sadd.s32 1, %s622_s13  ;;  %s42_s18 = sadd.s32 1, %s614_s11 }
   0xa   : > { %p35_p0 = scmp.ge.s32.totalorder %s33_s17, 2  ;;  %p49_p1 = scmp.ne.s32.totalorder %s614_s11, %s610_s10 }
   0xb   : > { %p50_p2 = scmp.eq.s32.totalorder %s626_s14, 0  ;;  %p55_p3 = scmp.ne.s32.totalorder %s610_s10, %s606_s9 }
   0xc   : > { %s895_s17 = smov (%p35_p0, %s33_s17), 0  ;;  %p56_p5 = scmp.eq.s32.totalorder %s384_s15, 0 }
   0xd   : > { %p689_p4 = por %p50_p2, %p49_p1  ;;  %s39_s20 = ssub.s32 %s622_s13, %s895_s17 }
   0xe   : > { %p107_p6 = scmp.eq.s32.totalorder %s384_s15, 1  ;;  %p40_p7 = scmp.eq.s32.totalorder %s39_s20, 0 }
   0xf   : > { %p695_p8 = por %p56_p5, %p55_p3  ;;  %p113_p10 = scmp.eq.s32.totalorder %s385_s16, 1 }
  0x10   : > { %p699_p9 = por %p107_p6, %p49_p1  ;;  %p421_p13 = scmp.lt.s32.totalorder %s626_s14, 2 }
  0x11   : > { %s877_s21 = scalar_select %p695_p8, 1, 0 }
  0x12   : > { %s878_s22 = scalar_select %p699_p9, 1, 0 }
  0x13   : > { %s704_s23 = scalar_select %p40_p7, %s614_s11, %s42_s18  }
  0x14   : > { %p706_p11 = por %p113_p10, %p55_p3  ;;  %s713_s25 = sand.u32 1, %s614_s11  }
  0x15   : > { %s388_s26 = sshll.u32 %s713_s25, 3  ;;  %s389_s27 = sshll.u32 %s622_s13, 7 }
  0x16   : > { %s879_s24 = scalar_select %p706_p11, 1, 0 }
  0x17   : > { %s722_s30 = scalar_lea.hbm %s871_s0, %s389_s27  ;;  %s137_s3 = scalar_lea.vmem [#allocation2], %s388_s26 }
  0x18   : > { %s145_s4 = sshll.u32 %s137_s3, 4  ;;  %p730_p0 = pnand %p421_p13, %p689_p4  ;;  %s726_s4 = int_to_ptr.vmem [resolvable:$true] %s145_s4 }
  0x19   : > { %s134_s6 = scalar_lea.sflag [#allocation3], %s713_s25  ;;  %s480_s7 = scalar_lea.hbm %s722_s30, 128 }
  0x1a   : > { %p481_p3 = scmp.ne.s32.totalorder %s722_s30, %s480_s7  ;;  %p482_p5 = pneg %p730_p0 }
  0x1b   : > { %s485_s16 = scalar_lea.hbm %s871_s0, 256  ;;  %p486_p4 = scmp.lt.u32.totalorder %s722_s30, %s871_s0 }
  0x1c   : > { %p483_p6 = pnand %p482_p5, %p481_p3  ;;  %p487_p10 = scmp.lt.u32.totalorder %s485_s16, %s480_s7 }
  0x1d   : > { %p489_p12 = scmp.lt.u32.totalorder %s480_s7, %s722_s30 }
  0x1e   : > { %p484_p7 = pneg %p483_p6  ;;  %p488_p13 = por %p487_p10, %p486_p4 }
  0x20   : > { %p490_p1 = por %p489_p12, %p488_p13 }
  0x22   : > { %p491_p2 = pnand %p490_p1, %p484_p7 }
  0x24   : > { %494 = shalt.err (!%p491_p2)
}
  0x25   : > { %s495_s20 = scalar_lea.vmem %s726_s4, 128  ;;  %s628_s28 = smov [#allocation2]  }
  0x26   : > { %p496_p3 = scmp.ne.s32.totalorder %s726_s4, %s495_s20  ;;  %s500_s29 = sshll.u32 %s628_s28, 4  ;;  %s501_s29 = int_to_ptr.vmem [resolvable:$false] %s500_s29 }
  0x27   : > { %s502_s3 = scalar_lea.vmem %s501_s29, 256  ;;  %p503_p9 = scmp.lt.s32.totalorder %s726_s4, %s501_s29 }
  0x28   : > { %p498_p6 = pnand %p496_p3, %p482_p5  ;;  %p504_p4 = scmp.lt.s32.totalorder %s502_s3, %s495_s20 }
  0x2a   : > { %p499_p11 = pneg %p498_p6  ;;  %p505_p10 = por %p504_p4, %p503_p9 }
  0x2c   : > { %p506_p12 = pnand %p505_p10, %p499_p11 }
  0x2e   : > { %509 = shalt.err (!%p506_p12)
}
  0x2f   : > { %413 = dma.hbm_to_vmem [thread:$0]  (!%p730_p0), %s722_s30, 128, %s726_s4, %s134_s6  }
  0x30   : > { %p881_p1 = scmp.lt.s32.totalorder %s626_s14, 3  ;;  %p882_p2 = scmp.ge.s32.totalorder %s626_s14, 1 }
  0x31   : > { %s775_s16 = scalar_lea.hbm %s872_s1, %s389_s27  ;;  %s156_s18 = scalar_lea.vmem [#allocation5], %s388_s26 }
  0x32   : > { %p766_p7 = pnand %p882_p2, %p881_p1  ;;  %s164_s19 = sshll.u32 %s156_s18, 4  ;;  %s165_s19 = int_to_ptr.vmem [resolvable:$true] %s164_s19 }
  0x33   : > { %s153_s30 = scalar_lea.sflag [#allocation6], %s713_s25  ;;  %s510_s4 = scalar_lea.hbm %s775_s16, 128 }
  0x34   : > { %s883_s7 = scalar_select %p766_p7, 1, 0 }
  0x35   : > { %p511_p9 = scmp.ne.s32.totalorder %s775_s16, %s510_s4  ;;  %s515_s27 = scalar_lea.hbm %s872_s1, 256 }
  0x36   : > { %p516_p3 = scmp.lt.u32.totalorder %s775_s16, %s872_s1  ;;  %p517_p6 = scmp.lt.u32.totalorder %s515_s27, %s510_s4 }
  0x37   : > { %p513_p11 = pnand %p511_p9, %p482_p5  ;;  %p519_p10 = scmp.lt.u32.totalorder %s510_s4, %s775_s16 }
  0x38   : > { %p518_p4 = por %p517_p6, %p516_p3 }
  0x39   : > { %p514_p13 = pneg %p513_p11 }
  0x3a   : > { %p520_p12 = por %p519_p10, %p518_p4 }
  0x3c   : > { %p521_p1 = pnand %p520_p12, %p514_p13 }
  0x3e   : > { %524 = shalt.err (!%p521_p1)
}
  0x3f   : > { %s525_s25 = scalar_lea.vmem %s165_s19, 128  ;;  %s629_s26 = smov [#allocation5]  }
  0x40   : > { %p526_p2 = scmp.ne.s32.totalorder %s165_s19, %s525_s25  ;;  %s530_s3 = sshll.u32 %s629_s26, 4  ;;  %s531_s3 = int_to_ptr.vmem [resolvable:$false] %s530_s3 }
  0x41   : > { %s532_s8 = scalar_lea.vmem %s531_s3, 256  ;;  %p533_p8 = scmp.lt.s32.totalorder %s165_s19, %s531_s3 }
  0x42   : > { %p528_p9 = pnand %p526_p2, %p482_p5  ;;  %p534_p7 = scmp.lt.s32.totalorder %s532_s8, %s525_s25 }
  0x44   : > { %p529_p11 = pneg %p528_p9  ;;  %p535_p3 = por %p534_p7, %p533_p8 }
  0x46   : > { %p536_p6 = pnand %p535_p3, %p529_p11 }
  0x48   : > { %539 = shalt.err (!%p536_p6)
}
  0x49   : > { %416 = dma.hbm_to_vmem [thread:$0]  (!%p730_p0), %s775_s16, 128, %s165_s19, %s153_s30  }
  0x4a   : > { %p884_p13 = scmp.ne.s32.totalorder %s883_s7, 0 }
  0x4b   : > { %s802_s15 = sand.u32 (!%p884_p13), 1, %s610_s10   ;;  %p885_p5 = scmp.ne.s32.totalorder (!%p884_p13), %s877_s21, 0 }
  0x4c   : > { %173 = sbr.rel (%p884_p13) target bundleno = 128 (0x80), region = 28  ;;  %s393_s18 = sshll.u32 (!%p884_p13), %s802_s15, 3 }
  0x4d   : > { %s176_s4 = scalar_lea.sflag (!%p884_p13), [#allocation3], %s802_s15  ;;  %s179_s6 = scalar_lea.vmem (!%p884_p13), [#allocation2], %s393_s18 }
  0x53   : > { %593 = dma.done.wait (%p885_p5), %s176_s4, 128  }
  0x54   : > { %595 = vsyncadd (%p885_p5), %s176_s4, 4294967168  ;;  %s185_s5 = scalar_lea.sflag [#allocation6], %s802_s15  ;;  %s188_s16 = scalar_lea.vmem [#allocation5], %s393_s18 }
  0x55   : > { %597 = dma.done.wait (%p885_p5), %s185_s5, 128  }
  0x56   : > { %599 = vsyncadd (%p885_p5), %s185_s5, 4294967168  ;;  %v223_v0 = vld [vmem:[%s179_s6] sm:$0xff]  ;;  %v224_v10 = vld [vmem:[%s188_s16] sm:$0xff]  ;;  %s402_s21 = smul.u32 24, %s802_s15  ;;  %s265_s29 = scalar_lea.sflag [#allocation4], %s802_s15 }
  0x57   : > { %v225_v1 = vmul.f32 0.5, %v223_v0  ;;  %v234_v2 = vsub.f32 0.0, %v223_v0  ;;  %474 = vlog2.f32 %v223_v0  ;;  %v246_v17 = vsub.f32 1.0, %v224_v10  ;;  %s403_s19 = smul.u32 384, %s618_s12  ;;  %p886_p0 = scmp.ne.s32.totalorder %s878_s22, 0 }
  0x58   : > { %s213_s7 = scalar_lea.vmem [#allocation7], %s402_s21  ;;  %s630_s12 = smov [#allocation7]  }
  0x59   : > { %476 = vtanh.f32 %v225_v1  ;;  %v235_v3 = vadd.f32 1.0, %v234_v2  ;;  %v238_v4 = vmul.f32 -0.5, %v234_v2  ;;  %v241_v7 = vand.u32 2147483647, %v234_v2  ;;  %s278_s30 = sshll.u32 %s213_s7, 4  ;;  %s820_s28 = scalar_lea.hbm %s873_s2, %s403_s19  ;;  %s822_s30 = int_to_ptr.vmem [resolvable:$true] %s278_s30 }
  0x5a   : > { %s540_s25 = scalar_lea.vmem %s822_s30, 384  ;;  %s544_s26 = sshll.u32 %s630_s12, 4  ;;  %s545_s26 = int_to_ptr.vmem [resolvable:$false] %s544_s26 }
  0x5b   : > { %478 = vlog2.f32 %v235_v3  ;;  %v239_v5 = vadd.f32 1.0, %v238_v4  ;;  %vm242_vm0 = vcmp.lt.f32.partialorder %v241_v7, 0.0004427343  ;;  %p541_p8 = scmp.ne.s32.totalorder %s822_s30, %s540_s25  ;;  %s546_s3 = scalar_lea.vmem %s545_s26, 768 }
  0x5c   : > { %p547_p10 = scmp.lt.s32.totalorder %s822_s30, %s545_s26  ;;  %p548_p12 = scmp.lt.s32.totalorder %s546_s3, %s540_s25 }
  0x5d   : > { %v240_v12 = vmul.f32 %v239_v5, %v234_v2  ;;  %p542_p7 = pnand %p541_p8, %p886_p0 }
  0x5e   : > { %p549_p1 = por %p548_p12, %p547_p10 }
  0x5f   : > { %p543_p4 = pneg %p542_p7 }
  0x61   : > { %v475_v6 = vpop.eup %474  ;;  %p550_p2 = pnand %p549_p1, %p543_p4 }
  0x62   : > { %v232_v8 = vmul.f32 0.6931472, %v475_v6 }
  0x63   : > { %v477_v9 = vpop.eup %476 }
  0x64   : > { %v227_v11 = vmul.f32 0.5, %v477_v9  ;;  %v233_v14 = vmax.f32 %v232_v8, -100.0 }
  0x65   : > { %v479_v13 = vpop.eup %478 }
  0x66   : > { %v228_v15 = vadd.f32 0.5, %v227_v11  ;;  %v237_v16 = vmul.f32 0.6931472, %v479_v13  ;;  %v245_v22 = vmul.f32 %v233_v14, %v224_v10 }
  0x68   : > { %v229_v18 = vmul.f32 %v228_v15, %v224_v10  ;;  %v230_v19 = vadd.f32 %v228_v15, %v224_v10  ;;  %v243_v20 = vsel %vm242_vm0, %v240_v12, %v237_v16 }
  0x69   : > { %v244_v21 = vmax.f32 %v243_v20, -100.0 }
  0x6a   : > { %253 = vst [vmem:[%s213_s7] sm:$0xff] %v229_v18  ;;  %396 = vst [vmem:[%s213_s7 + $0x8] sm:$0xff] %v230_v19 }
  0x6b   : > { %v247_v23 = vmul.f32 %v246_v17, %v244_v21 }
  0x6d   : > { %v248_v24 = vadd.f32 %v247_v23, %v245_v22 }
  0x6f   : > { %v249_v25 = vsub.f32 0.0, %v248_v24 }
  0x71   : > { %398 = vst [vmem:[%s213_s7 + $0x10] sm:$0xff] %v249_v25 }
  0x72   : > { %553 = shalt.err (!%p550_p2)
}
  0x73   : > { %s554_s8 = scalar_lea.hbm %s820_s28, 384  ;;  %s558_s6 = scalar_lea.hbm %s873_s2, 768 }
  0x74   : > { %p555_p9 = scmp.ne.s32.totalorder %s820_s28, %s554_s8  ;;  %p559_p6 = scmp.lt.u32.totalorder %s820_s28, %s873_s2 }
  0x75   : > { %p560_p13 = scmp.lt.u32.totalorder %s558_s6, %s554_s8  ;;  %p562_p8 = scmp.lt.u32.totalorder %s554_s8, %s820_s28 }
  0x76   : > { %p556_p11 = pnand %p555_p9, %p886_p0 }
  0x77   : > { %p561_p5 = por %p560_p13, %p559_p6 }
  0x78   : > { %p557_p3 = pneg %p556_p11 }
  0x79   : > { %p563_p7 = por %p562_p8, %p561_p5 }
  0x7b   : > { %p564_p4 = pnand %p563_p7, %p557_p3 }
  0x7d   : > { %567 = shalt.err (!%p564_p4)
}
  0x7e   : > { %s631_s21 = smov 128   ;;  %s632_s7 = smov 8  }
  0x7f   : > { %408 = dma.vmem_to_hbm [thread:$0]  (%p886_p0), %s822_s30, 384, %s820_s28, %s265_s29, %s631_s21, %s631_s21, %s632_s7  }
  0x80 PF: > { %s293_s19 = sand.u32 1, %s606_s9   ;;  %p887_p10 = scmp.ne.s32.totalorder %s879_s24, 0 }
  0x81   : > { %p888_p12 = scmp.ge.s32.totalorder %s626_s14, 2  ;;  %s294_s20 = scalar_lea.sflag [#allocation4], %s293_s19 }
  0x83   : > { %p418_p1 = pnand %p888_p12, %p887_p10 }
  0x85   : > { %601 = dma.done.wait (!%p418_p1), %s294_s20, 384  }
  0x86   : > { %603 = vsyncadd (!%p418_p1), %s294_s20, 4294966912  ;;  %s21_s14 = sadd.s32 1, %s626_s14   ;;  %s889_s9 = smov %s610_s10 }
  0x87   : > { %p18_p2 = scmp.ge.s32.totalorder %s21_s14, 4   ;;  %s890_s10 = smov %s614_s11 }
  0x88   : > { %s891_s11 = smov %s704_s23  ;;  %s892_s12 = smov %s622_s13 }
  0x89   : > { %s893_s13 = smov %s895_s17  ;;  %20 = sbr.rel (!%p18_p2) target bundleno = 8 (0x8), region = 92 }
  0x90   :  { %299 = vsyncpa [#allocation3], 1 }
  0x91   :  { %301 = vsyncpa [#allocation3 + $0x1], 1 }
  0x92   :  { %302 = vsyncpa [#allocation6], 1 }
  0x93   :  { %304 = vsyncpa [#allocation6 + $0x1], 1 }
  0x94   :  { %305 = vsyncpa [#allocation4], 1 }
  0x95   :  { %307 = vsyncpa [#allocation4 + $0x1], 1 }

</bundles_post_ra>
